<compile_context>
chip_gen: v5e
topology: v5e:2x2
jax: 0.10.0
libtpu: 0.0.40
codegen_flags: <defaults>
</compile_context>

<pallas_src>
import jax
import jax.numpy as jnp
from jax.experimental import pallas as pl
from jax.experimental.pallas import tpu as pltpu


def _round_up(n, m):
    return ((n + m - 1) // m) * m


def encoder_kernel(x_ref, w1_ref, b1_ref, wh_ref, bh_ref, out_ref):
    # h = tanh(x @ W1 + b1): MXU matmul with f32 accumulation; bias-add and
    # tanh stay in f32 (safe on v5e which has no bf16 VPU/EUP).
    h = jnp.tanh(
        jnp.dot(x_ref[...], w1_ref[...], preferred_element_type=jnp.float32)
        + b1_ref[...]
    )
    # Single fused head matmul over the concatenated (and lane-padded) head
    # weights; one dense store to a 128-aligned output slab.
    out_ref[...] = (
        jnp.dot(h.astype(wh_ref.dtype), wh_ref[...],
                preferred_element_type=jnp.float32)
        + bh_ref[...]
    ).astype(out_ref.dtype)


def encoder_forward(x, params, *, compute_dtype=jnp.float32, batch_tile=None):
    """x: (B, 784) f32. params: dict from init_params.

    Returns (content_mu, content_logvar, style_mu, style_logvar), all f32.
    compute_dtype: jnp.float32 (exact) or jnp.bfloat16 (v6e/v7x MXU-native).
    batch_tile: rows per grid step (must divide B and be a multiple of 8);
                defaults to the whole batch in one block.
    """
    B, in_dim = x.shape
    mdim = params["w1"].shape[1]
    cdim = params["w_cmu"].shape[1]
    sdim = params["w_smu"].shape[1]

    head_dim = 2 * cdim + 2 * sdim
    mdim_pad = _round_up(mdim, 128)   # lane-dense hidden activation
    head_pad = _round_up(head_dim, 128)  # lane-dense output slab

    f32 = jnp.float32

    # --- pack / pad parameters (exact: padded weight rows/cols and biases are 0) ---
    w1p = jnp.zeros((in_dim, mdim_pad), f32).at[:, :mdim].set(params["w1"])
    b1p = jnp.zeros((1, mdim_pad), f32).at[:, :mdim].set(params["b1"])

    wh = jnp.concatenate(
        [params["w_cmu"], params["w_clv"], params["w_smu"], params["w_slv"]],
        axis=1)                                           # (mdim, head_dim)
    bh = jnp.concatenate(
        [params["b_cmu"], params["b_clv"], params["b_smu"], params["b_slv"]],
        axis=1)                                           # (1, head_dim)
    whp = jnp.zeros((mdim_pad, head_pad), f32).at[:mdim, :head_dim].set(wh)
    bhp = jnp.zeros((1, head_pad), f32).at[:, :head_dim].set(bh)

    # Matmul operands in compute_dtype; biases stay f32 (bias/tanh done in f32).
    xc = x.astype(compute_dtype)
    w1p = w1p.astype(compute_dtype)
    whp = whp.astype(compute_dtype)

    # --- batch tiling (parallel axis -> both v7x TensorCores for big batches) ---
    tb = batch_tile if batch_tile is not None else B
    if B % tb != 0 or (tb != B and tb % 8 != 0):
        tb = B
    grid = (B // tb,)

    itemsize = jnp.dtype(compute_dtype).itemsize
    bytes_accessed = (
        B * in_dim * itemsize                 # x
        + in_dim * mdim_pad * itemsize        # W1
        + mdim_pad * head_pad * itemsize      # W_heads
        + (mdim_pad + head_pad) * 4           # biases (f32)
        + B * head_pad * 4                    # output slab (f32)
    )
    cost = pl.CostEstimate(
        flops=2 * B * (in_dim * mdim_pad + mdim_pad * head_pad),
        transcendentals=B * mdim_pad,
        bytes_accessed=bytes_accessed,
    )

    out = pl.pallas_call(
        encoder_kernel,
        out_shape=jax.ShapeDtypeStruct((B, head_pad), jnp.float32),
        grid=grid,
        in_specs=[
            pl.BlockSpec((tb, in_dim), lambda i: (i, 0)),        # x tile
            pl.BlockSpec((in_dim, mdim_pad), lambda i: (0, 0)),  # W1 (resident)
            pl.BlockSpec((1, mdim_pad), lambda i: (0, 0)),       # b1 (resident)
            pl.BlockSpec((mdim_pad, head_pad), lambda i: (0, 0)),  # W_heads
            pl.BlockSpec((1, head_pad), lambda i: (0, 0)),       # b_heads
        ],
        out_specs=pl.BlockSpec((tb, head_pad), lambda i: (i, 0)),
        compiler_params=pltpu.CompilerParams(
            dimension_semantics=("parallel",)),
        cost_estimate=cost,
    )(xc, w1p, b1p, whp, bhp)

    # Free XLA slices back into the four heads (outputs are f32).
    cmu = out[:, 0:cdim]
    clv = out[:, cdim:2 * cdim]
    smu = out[:, 2 * cdim:2 * cdim + sdim]
    slv = out[:, 2 * cdim + sdim:2 * cdim + 2 * sdim]
    return cmu, clv, smu, slv


def init_params(key, mdim, cdim, sdim, in_dim=784):
    """Deterministic param init (PyTorch-Linear-like uniform bounds).

    Weights are stored as (in_features, out_features) so y = x @ W + b matches
    torch.nn.Linear semantics.
    """
    def linear(key, fan_in, fan_out):
        kw, kb = jax.random.split(key)
        bound = 1.0 / jnp.sqrt(fan_in)
        w = jax.random.uniform(kw, (fan_in, fan_out), jnp.float32, -bound, bound)
        b = jax.random.uniform(kb, (1, fan_out), jnp.float32, -bound, bound)
        return w, b

    k1, k2, k3, k4, k5 = jax.random.split(key, 5)
    w1, b1 = linear(k1, in_dim, mdim)
    w_cmu, b_cmu = linear(k2, mdim, cdim)
    w_clv, b_clv = linear(k3, mdim, cdim)
    w_smu, b_smu = linear(k4, mdim, sdim)
    w_slv, b_slv = linear(k5, mdim, sdim)
    return {
        "w1": w1, "b1": b1,
        "w_cmu": w_cmu, "b_cmu": b_cmu,
        "w_clv": w_clv, "b_clv": b_clv,
        "w_smu": w_smu, "b_smu": b_smu,
        "w_slv": w_slv, "b_slv": b_slv,
    }


def encoder_ref(x, p):
    """Pure-JAX reference mirroring the PyTorch forward."""
    h = jnp.tanh(x @ p["w1"] + p["b1"])
    return (
        h @ p["w_cmu"] + p["b_cmu"],
        h @ p["w_clv"] + p["b_clv"],
        h @ p["w_smu"] + p["b_smu"],
        h @ p["w_slv"] + p["b_slv"],
    )


if __name__ == "__main__":
    B, MDIM, CDIM, SDIM = 16, 32, 16, 8

    key = jax.random.PRNGKey(0)
    kx, kp = jax.random.split(key)
    x = jax.random.normal(kx, (B, 784), jnp.float32)
    params = init_params(kp, MDIM, CDIM, SDIM)

    refs = encoder_ref(x, params)

    # Exact f32 path, with a batch grid of 2 tiles (parallel axis).
    outs = jax.block_until_ready(encoder_forward(x, params, batch_tile=8))
    for o, r in zip(outs, refs):
        assert o.shape == r.shape and o.dtype == r.dtype
        assert jnp.max(jnp.abs(o - r)) < 1e-4, float(jnp.max(jnp.abs(o - r)))

    # bf16 compute path (v6e/v7x MXU-native); f32 accumulation, looser tolerance.
    outs_bf16 = jax.block_until_ready(
        encoder_forward(x, params, compute_dtype=jnp.bfloat16, batch_tile=16))
    for o, r in zip(outs_bf16, refs):
        assert o.shape == r.shape and o.dtype == r.dtype
        assert jnp.max(jnp.abs(o - r)) < 5e-2, float(jnp.max(jnp.abs(o - r)))

    print("KERNEL_OK")
</pallas_src>

<mosaic_0001>
module attributes {stable_mosaic.version = 11 : i64} {
  func.func @encoder_kernel(%arg0: i32, %arg1: memref<8x784xf32, #tpu.memory_space<vmem>>, %arg2: memref<784x128xf32, #tpu.memory_space<vmem>>, %arg3: memref<1x128xf32, #tpu.memory_space<vmem>>, %arg4: memref<128x128xf32, #tpu.memory_space<vmem>>, %arg5: memref<1x128xf32, #tpu.memory_space<vmem>>, %arg6: memref<8x128xf32, #tpu.memory_space<vmem>>) attributes {dimension_semantics = [#tpu.dimension_semantics<parallel>], iteration_bounds = array<i64: 2>, scalar_prefetch = 0 : i64, scratch_operands = 0 : i64, tpu.core_type = #tpu.core_type<tc>, window_params = [{transform_indices = @transform_0, window_bounds = array<i64: 8, 784>}, {pipeline_mode = #tpu.pipeline_mode<synchronous>, transform_indices = @transform_1, window_bounds = array<i64: 784, 128>}, {pipeline_mode = #tpu.pipeline_mode<synchronous>, transform_indices = @transform_2, window_bounds = array<i64: 1, 128>}, {pipeline_mode = #tpu.pipeline_mode<synchronous>, transform_indices = @transform_3, window_bounds = array<i64: 128, 128>}, {pipeline_mode = #tpu.pipeline_mode<synchronous>, transform_indices = @transform_4, window_bounds = array<i64: 1, 128>}, {transform_indices = @transform_5, window_bounds = array<i64: 8, 128>}]} {
    %c0 = arith.constant 0 : index
    %c0_0 = arith.constant 0 : index
    %0 = vector.load %arg1[%c0, %c0_0] : memref<8x784xf32, #tpu.memory_space<vmem>>, vector<8x784xf32>
    %c0_1 = arith.constant 0 : index
    %c0_2 = arith.constant 0 : index
    %1 = vector.load %arg2[%c0_1, %c0_2] : memref<784x128xf32, #tpu.memory_space<vmem>>, vector<784x128xf32>
    %cst = arith.constant dense<0.000000e+00> : vector<8x128xf32>
    %2 = tpu.matmul %0, %1, %cst {dimension_numbers = #tpu.dot_dimension_numbers<[1], [0], [0], [1], [0, 0, 1, 1], [], []>} : vector<8x784xf32>, vector<784x128xf32>, vector<8x128xf32> -> vector<8x128xf32>
    %c0_3 = arith.constant 0 : index
    %c0_4 = arith.constant 0 : index
    %3 = vector.load %arg3[%c0_3, %c0_4] : memref<1x128xf32, #tpu.memory_space<vmem>>, vector<1x128xf32>
    %4 = vector.broadcast %3 : vector<1x128xf32> to vector<8x128xf32>
    %5 = arith.addf %2, %4 : vector<8x128xf32>
    %6 = math.tanh %5 : vector<8x128xf32>
    %c0_5 = arith.constant 0 : index
    %c0_6 = arith.constant 0 : index
    %7 = vector.load %arg4[%c0_5, %c0_6] : memref<128x128xf32, #tpu.memory_space<vmem>>, vector<128x128xf32>
    %cst_7 = arith.constant dense<0.000000e+00> : vector<8x128xf32>
    %8 = tpu.matmul %6, %7, %cst_7 {dimension_numbers = #tpu.dot_dimension_numbers<[1], [0], [0], [1], [0, 0, 1, 1], [], []>} : vector<8x128xf32>, vector<128x128xf32>, vector<8x128xf32> -> vector<8x128xf32>
    %c0_8 = arith.constant 0 : index
    %c0_9 = arith.constant 0 : index
    %9 = vector.load %arg5[%c0_8, %c0_9] : memref<1x128xf32, #tpu.memory_space<vmem>>, vector<1x128xf32>
    %10 = vector.broadcast %9 : vector<1x128xf32> to vector<8x128xf32>
    %11 = arith.addf %8, %10 : vector<8x128xf32>
    %c0_10 = arith.constant 0 : index
    %c0_11 = arith.constant 0 : index
    %12 = vector.load %arg6[%c0_10, %c0_11] : memref<8x128xf32, #tpu.memory_space<vmem>>, vector<8x128xf32>
    tpu.vector_store %arg6[%c0_10, %c0_11], %11 {strides = array<i32>} : memref<8x128xf32, #tpu.memory_space<vmem>>, vector<8x128xf32>,
    return
  }
  func.func @transform_0(%arg0: i32) -> (i32, i32) {
    %c0_i32 = arith.constant 0 : i32
    %c0_i32_0 = arith.constant 0 : i32
    return %arg0, %c0_i32 : i32, i32
  }
  func.func @transform_1(%arg0: i32) -> (i32, i32) {
    %c0_i32 = arith.constant 0 : i32
    %c0_i32_0 = arith.constant 0 : i32
    %c0_i32_1 = arith.constant 0 : i32
    return %c0_i32, %c0_i32_0 : i32, i32
  }
  func.func @transform_2(%arg0: i32) -> (i32, i32) {
    %c0_i32 = arith.constant 0 : i32
    %c0_i32_0 = arith.constant 0 : i32
    %c0_i32_1 = arith.constant 0 : i32
    return %c0_i32, %c0_i32_0 : i32, i32
  }
  func.func @transform_3(%arg0: i32) -> (i32, i32) {
    %c0_i32 = arith.constant 0 : i32
    %c0_i32_0 = arith.constant 0 : i32
    %c0_i32_1 = arith.constant 0 : i32
    return %c0_i32, %c0_i32_0 : i32, i32
  }
  func.func @transform_4(%arg0: i32) -> (i32, i32) {
    %c0_i32 = arith.constant 0 : i32
    %c0_i32_0 = arith.constant 0 : i32
    %c0_i32_1 = arith.constant 0 : i32
    return %c0_i32, %c0_i32_0 : i32, i32
  }
  func.func @transform_5(%arg0: i32) -> (i32, i32) {
    %c0_i32 = arith.constant 0 : i32
    %c0_i32_0 = arith.constant 0 : i32
    return %arg0, %c0_i32 : i32, i32
  }
}

</mosaic_0001>

<bundles_post_ra>
// kernel: tpu_custom_call.1
= control target key start
LH: loop header
LB: loop body
LE: loop exit
PB: predicated region body
PF: predicated region fallthrough
CT: control target
= control target key end

     0   :  { %s1118_s0 = inlined_call_operand.hbm [shape: f32[16,784], index: 0, kind: input, shape index: {}]   ;;  %s1119_s1 = inlined_call_operand.hbm [shape: f32[784,128], index: 1, kind: input, shape index: {}]   ;;  %s1120_s2 = inlined_call_operand.vmem [shape: f32[1,128], index: 2, kind: input, shape index: {}]   ;;  %s1121_s3 = inlined_call_operand.hbm [shape: f32[128,128], index: 3, kind: input, shape index: {}]   ;;  %s1122_s4 = inlined_call_operand.vmem [shape: f32[1,128], index: 4, kind: input, shape index: {}]   ;;  %s1123_s5 = inlined_call_operand.hbm [shape: f32[16,128], index: 5, kind: output, shape index: {}]  }
   0x1   :  { %1124 = sst [smem:[#allocation12_spill]] %s1119_s1 }
   0x2   :  { %10 = vsyncpa [#allocation3], 0 }
   0x3   :  { %12 = vsyncpa [#allocation3 + $0x1], 0 }
   0x4   :  { %13 = vsyncpa [#allocation6], 0 }
   0x5   :  { %14 = vsyncpa [#allocation4], 0 }
   0x6   :  { %16 = vsyncpa [#allocation4 + $0x1], 0  ;;  %s963_s18 = smov 0   ;;  %s965_s19 = smov 0  }
   0x7   :  { %s967_s20 = smov 0   ;;  %s969_s21 = smov 0  }
   0x8 LB: > { %s1125_s1 = sld [smem:[#allocation12_spill]]  ;;  %s987_s25 = sadd.s32 4294967295, %s927_s21   ;;  %s927_s21 = sphi %s969_s21, %s1135_s21   ;;  %s923_s20 = sphi %s967_s20, %s1134_s20   ;;  %s919_s19 = sphi %s965_s19, %s1133_s19   ;;  %s915_s18 = sphi %s963_s18, %s1132_s18  }
   0x9   : > { %p677_p0 = scmp.ge.s32.totalorder %s927_s21, 1  ;;  %p43_p1 = scmp.eq.s32.totalorder %s987_s25, 0 }
   0xa   : > { %p163_p2 = scmp.lt.s32.totalorder %s927_s21, 3  ;;  %s929_s27 = smov [#allocation5]  }
   0xb   : > { %s176_s28 = sshll.u32 %s929_s27, 4  ;;  %s191_s6 = sshll.u32 %s1121_s3, 4  ;;  %s177_s28 = int_to_ptr.vmem [resolvable:$true] %s176_s28  ;;  %s192_s6 = int_to_ptr.hbm [resolvable:$true] %s191_s6 }
   0xc   : > { %p992_p3 = pnand %p677_p0, %p163_p2  ;;  %s930_s7 = smov [#allocation7]  }
   0xd   : > { %s193_s8 = sshll.u32 %s930_s7, 4  ;;  %s931_s9 = smov 128   ;;  %s194_s8 = int_to_ptr.vmem [resolvable:$true] %s193_s8 }
   0xe   : > { %s174_s24 = sshll.u32 %s1125_s1, 4  ;;  %p706_p4 = pneg %p992_p3  ;;  %s175_s24 = int_to_ptr.hbm [resolvable:$true] %s174_s24 }
   0xf   : > { %s932_s10 = smov 8   ;;  %s676_s11 = sadd.s32 4294967294, %s927_s21  }
  0x10   : > { %p707_p6 = pnand %p706_p4, %p43_p1  ;;  %s1006_s12 = sadd.s32 1, %s927_s21  }
  0x11   : > { %s26_s13 = ssub.s32 %s927_s21, %s1006_s12  ;;  %s29_s14 = sadd.s32 1, %s923_s20 }
  0x12   : > { %709 = dma.hbm_to_vmem [thread:$0]  (!%p707_p6), %s175_s24, 12544, %s177_s28, [#allocation6], %s931_s9, %s931_s9, %s932_s10  }
  0x13   : > { %712 = dma.hbm_to_vmem [thread:$0]  (!%p707_p6), %s192_s6, 2048, %s194_s8, [#allocation6], %s931_s9, %s931_s9, %s932_s10  }
  0x14   : > { %p27_p7 = scmp.eq.s32.totalorder %s26_s13, 0  ;;  %p36_p8 = scmp.ne.s32.totalorder %s923_s20, %s919_s19 }
  0x15   : > { %p37_p9 = scmp.eq.s32.totalorder %s927_s21, 0  ;;  %p42_p10 = scmp.ne.s32.totalorder %s919_s19, %s915_s18 }
  0x16   : > { %s1017_s15 = scalar_select %p27_p7, %s923_s20, %s29_s14  }
  0x17   : > { %p38_p11 = por %p37_p9, %p36_p8  ;;  %p1021_p12 = por %p43_p1, %p42_p10 }
  0x18   : > { %p150_p13 = scmp.eq.s32.totalorder %s987_s25, 1  ;;  %p156_p0 = scmp.eq.s32.totalorder %s676_s11, 1 }
  0x19   : > { %p723_p2 = scmp.lt.s32.totalorder %s927_s21, 2  ;;  %s210_s17 = sand.u32 1, %s923_s20  }
  0x1a   : > { %p1028_p4 = por %p150_p13, %p36_p8  ;;  %p1032_p6 = por %p156_p0, %p42_p10 }
  0x1b   : > { %s691_s24 = smul.u32 56, %s210_s17  ;;  %p1037_p7 = pnand %p723_p2, %p38_p11 }
  0x1c   : > { %s692_s27 = smul.u32 56, %s927_s21  ;;  %s211_s10 = scalar_lea.sflag [#allocation3], %s210_s17 }
  0x1d   : > { %s214_s7 = scalar_lea.vmem [#allocation2], %s691_s24  ;;  %p831_p9 = pneg %p1037_p7 }
  0x1e   : > { %s219_s6 = scalar_lea.hbm %s1118_s0, %s692_s27  ;;  %s223_s8 = sshll.u32 %s214_s7, 4  ;;  %s224_s8 = int_to_ptr.vmem [resolvable:$true] %s223_s8 }
  0x1f   : > { %s221_s9 = sshll.u32 %s219_s6, 4  ;;  %s834_s29 = scalar_lea.hbm %s1118_s0, 112  ;;  %s222_s9 = int_to_ptr.hbm [resolvable:$true] %s221_s9 }
  0x20   : > { %s827_s11 = sshra.s32 %s222_s9, 4  ;;  %s828_s11 = int_to_ptr.hbm [resolvable:$true] %s827_s11 }
  0x21   : > { %s829_s13 = scalar_lea.hbm %s828_s11, 56  ;;  %p835_p13 = scmp.lt.s32.totalorder %s828_s11, %s1118_s0 }
  0x22   : > { %p830_p8 = scmp.ne.s32.totalorder %s828_s11, %s829_s13  ;;  %p836_p0 = scmp.lt.s32.totalorder %s834_s29, %s829_s13 }
  0x24   : > { %p832_p10 = pnand %p831_p9, %p830_p8  ;;  %p837_p2 = por %p836_p0, %p835_p13 }
  0x26   : > { %p833_p11 = pneg %p832_p10 }
  0x28   : > { %p838_p5 = pnand %p837_p2, %p833_p11 }
  0x2a   : > { %841 = shalt.err (!%p838_p5)
}
  0x2b   : > { %716 = dma.hbm_to_vmem [thread:$0]  (!%p1037_p7), %s222_s9, 896, %s224_s8, %s211_s10  }
  0x2c   : > { %232 = sbr.rel (%p992_p3) target bundleno = 392 (0x188), region = 40  ;;  %s1057_s17 = sand.u32 (!%p992_p3), 1, %s919_s19  }
  0x2d   : > { %s693_s1 = smul.u32 (!%p992_p3), 56, %s1057_s17  ;;  %s235_s24 = scalar_lea.sflag (!%p992_p3), [#allocation3], %s1057_s17 }
  0x2f   : > { %s1061_s6 = scalar_lea.vmem (!%p992_p3), [#allocation2], %s693_s1 }
  0x31   : > { %902 = dma.done.wait (%p1021_p12), %s235_s24, 896  }
  0x32   : > { %904 = vsyncadd (%p1021_p12), %s235_s24, 4294966400 }
  0x33   : > { %906 = dma.done.wait (%p43_p1), [#allocation6], 14592  }
  0x34   : > { %908 = vsyncadd (%p43_p1), [#allocation6], 4294952704  ;;  %v298_v0 = vld [vmem:[#allocation5 + $0x78] sm:$0xff]  ;;  %v297_v1 = vld [vmem:[#allocation5 + $0x70] sm:$0xff]  ;;  %vm385_vm0 = vcmask 130048   ;;  %s685_s28 = sshll.u32 %s1057_s17, 3 }
  0x35   : > { %v314_v2 = vld [vmem:[#allocation5 + $0xf8] sm:$0xff]  ;;  %389 = vmatpush.msra.mxu0 %v298_v0  ;;  %v313_v3 = vld [vmem:[#allocation5 + $0xf0] sm:$0xff]  ;;  %v296_v4 = vld [vmem:[#allocation5 + $0x68] sm:$0xff]  ;;  %s688_s7 = sshll.u32 %s987_s25, 3  ;;  %s275_s14 = scalar_lea.vmem [#allocation8], %s685_s28 }
  0x36   : > { %409 = vmatpush.msra.mxu1 %v314_v2  ;;  %v312_v5 = vld [vmem:[#allocation5 + $0xe8] sm:$0xff]  ;;  %v295_v6 = vld [vmem:[#allocation5 + $0x60] sm:$0xff]  ;;  %v294_v8 = vld [vmem:[#allocation5 + $0x58] sm:$0xff]  ;;  %s582_s10 = scalar_lea.hbm %s1123_s5, %s688_s7  ;;  %s584_s29 = sshll.u32 %s275_s14, 4  ;;  %s585_s29 = int_to_ptr.vmem [resolvable:$true] %s584_s29 }
  0x37   : > { %390 = vmatpush.msra.mxu0 %v297_v1  ;;  %v311_v7 = vld [vmem:[#allocation5 + $0xe0] sm:$0xff]  ;;  %v310_v9 = vld [vmem:[#allocation5 + $0xd8] sm:$0xff]  ;;  %v293_v10 = vld [vmem:[#allocation5 + $0x50] sm:$0xff]  ;;  %s586_s30 = sshll.u32 %s582_s10, 4  ;;  %s572_s27 = scalar_lea.sflag [#allocation4], %s1057_s17  ;;  %s587_s30 = int_to_ptr.hbm [resolvable:$true] %s586_s30 }
  0x38   : > { %410 = vmatpush.msra.mxu1 %v313_v3  ;;  %v330_v11 = vld [vmem:[#allocation5 + $0x178] sm:$0xff]  ;;  %v309_v12 = vld [vmem:[#allocation5 + $0xd0] sm:$0xff]  ;;  %v328_v15 = vld [vmem:[#allocation5 + $0x168] sm:$0xff]  ;;  %s871_s1 = sshra.s32 %s587_s30, 4  ;;  %s877_s26 = scalar_lea.hbm %s1123_s5, 16  ;;  %s872_s1 = int_to_ptr.hbm [resolvable:$true] %s871_s1 }
  0x39   : > { %391 = vmatpush.msra.mxu0 %v296_v4  ;;  %429 = vmatpush.msra.mxu2 %v330_v11  ;;  %v329_v13 = vld [vmem:[#allocation5 + $0x170] sm:$0xff]  ;;  %v346_v14 = vld [vmem:[#allocation5 + $0x1f8] sm:$0xff]  ;;  %v292_v17 = vld [vmem:[#allocation5 + $0x48] sm:$0xff]  ;;  %s873_s25 = scalar_lea.hbm %s872_s1, 8  ;;  %p878_p12 = scmp.lt.s32.totalorder %s872_s1, %s1123_s5 }
  0x3a   : > { %411 = vmatpush.msra.mxu1 %v312_v5  ;;  %v345_v16 = vld [vmem:[#allocation5 + $0x1f0] sm:$0xff]  ;;  %v308_v18 = vld [vmem:[#allocation5 + $0xc8] sm:$0xff]  ;;  %449 = vmatpush.msra.mxu3 %v346_v14  ;;  %v327_v19 = vld [vmem:[#allocation5 + $0x160] sm:$0xff]  ;;  %p874_p1 = scmp.ne.s32.totalorder %s872_s1, %s873_s25  ;;  %p879_p7 = scmp.lt.s32.totalorder %s877_s26, %s873_s25 }
  0x3b   : > { %392 = vmatpush.msra.mxu0 %v295_v6  ;;  %430 = vmatpush.msra.mxu2 %v329_v13  ;;  %v344_v20 = vld [vmem:[#allocation5 + $0x1e8] sm:$0xff]  ;;  %v291_v21 = vld [vmem:[#allocation5 + $0x40] sm:$0xff]  ;;  %v326_v23 = vld [vmem:[#allocation5 + $0x158] sm:$0xff] }
  0x3c   : > { %412 = vmatpush.msra.mxu1 %v311_v7  ;;  %v307_v22 = vld [vmem:[#allocation5 + $0xc0] sm:$0xff]  ;;  %450 = vmatpush.msra.mxu3 %v345_v16  ;;  %v290_v25 = vld [vmem:[#allocation5 + $0x38] sm:$0xff]  ;;  %v325_v27 = vld [vmem:[#allocation5 + $0x150] sm:$0xff]  ;;  %p875_p3 = pnand %p874_p1, %p1028_p4  ;;  %p880_p8 = por %p879_p7, %p878_p12 }
  0x3d   : > { %393 = vmatpush.msra.mxu0 %v294_v8  ;;  %431 = vmatpush.msra.mxu2 %v328_v15  ;;  %v343_v24 = vld [vmem:[#allocation5 + $0x1e0] sm:$0xff]  ;;  %v306_v26 = vld [vmem:[#allocation5 + $0xb8] sm:$0xff]  ;;  %v289_v29 = vld [vmem:[#allocation5 + $0x30] sm:$0xff] }
  0x3e   : > { %413 = vmatpush.msra.mxu1 %v310_v9  ;;  %451 = vmatpush.msra.mxu3 %v344_v20  ;;  %v342_v28 = vld [vmem:[#allocation5 + $0x1d8] sm:$0xff]  ;;  %v305_v30 = vld [vmem:[#allocation5 + $0xb0] sm:$0xff]  ;;  %v324_v31 = vld [vmem:[#allocation5 + $0x148] sm:$0xff]  ;;  %p876_p5 = pneg %p875_p3 }
  0x3f   : > { %394 = vmatpush.msra.mxu0 %v293_v10  ;;  %432 = vmatpush.msra.mxu2 %v327_v19  ;;  %v341_v32 = vld [vmem:[#allocation5 + $0x1d0] sm:$0xff]  ;;  %v288_v33 = vld [vmem:[#allocation5 + $0x28] sm:$0xff]  ;;  %v323_v35 = vld [vmem:[#allocation5 + $0x140] sm:$0xff] }
  0x40   : > { %414 = vmatpush.msra.mxu1 %v309_v12  ;;  %452 = vmatpush.msra.mxu3 %v343_v24  ;;  %v304_v34 = vld [vmem:[#allocation5 + $0xa8] sm:$0xff]  ;;  %v287_v37 = vld [vmem:[#allocation5 + $0x20] sm:$0xff]  ;;  %v322_v39 = vld [vmem:[#allocation5 + $0x138] sm:$0xff]  ;;  %p881_p9 = pnand %p880_p8, %p876_p5 }
  0x41   : > { %395 = vmatpush.msra.mxu0 %v292_v17  ;;  %433 = vmatpush.msra.mxu2 %v326_v23  ;;  %v340_v36 = vld [vmem:[#allocation5 + $0x1c8] sm:$0xff]  ;;  %v303_v38 = vld [vmem:[#allocation5 + $0xa0] sm:$0xff]  ;;  %v286_v41 = vld [vmem:[#allocation5 + $0x18] sm:$0xff] }
  0x42   : > { %415 = vmatpush.msra.mxu1 %v308_v18  ;;  %453 = vmatpush.msra.mxu3 %v342_v28  ;;  %v339_v40 = vld [vmem:[#allocation5 + $0x1c0] sm:$0xff]  ;;  %v302_v42 = vld [vmem:[#allocation5 + $0x98] sm:$0xff]  ;;  %v321_v43 = vld [vmem:[#allocation5 + $0x130] sm:$0xff] }
  0x43   : > { %396 = vmatpush.msra.mxu0 %v291_v21  ;;  %434 = vmatpush.msra.mxu2 %v325_v27  ;;  %v338_v44 = vld [vmem:[#allocation5 + $0x1b8] sm:$0xff]  ;;  %v285_v45 = vld [vmem:[#allocation5 + $0x10] sm:$0xff]  ;;  %v320_v47 = vld [vmem:[#allocation5 + $0x128] sm:$0xff] }
  0x44   : > { %416 = vmatpush.msra.mxu1 %v307_v22  ;;  %454 = vmatpush.msra.mxu3 %v341_v32  ;;  %v301_v46 = vld [vmem:[#allocation5 + $0x90] sm:$0xff]  ;;  %v284_v49 = vld [vmem:[#allocation5 + $0x8] sm:$0xff]  ;;  %v319_v51 = vld [vmem:[#allocation5 + $0x120] sm:$0xff] }
  0x45   : > { %397 = vmatpush.msra.mxu0 %v290_v25  ;;  %435 = vmatpush.msra.mxu2 %v324_v31  ;;  %v337_v48 = vld [vmem:[#allocation5 + $0x1b0] sm:$0xff]  ;;  %v300_v50 = vld [vmem:[#allocation5 + $0x88] sm:$0xff]  ;;  %v283_v53 = vld [vmem:[#allocation5] sm:$0xff] }
  0x46   : > { %417 = vmatpush.msra.mxu1 %v306_v26  ;;  %455 = vmatpush.msra.mxu3 %v340_v36  ;;  %v336_v52 = vld [vmem:[#allocation5 + $0x1a8] sm:$0xff]  ;;  %v299_v54 = vld [vmem:[#allocation5 + $0x80] sm:$0xff]  ;;  %v362_v55 = vld [vmem:[#allocation5 + $0x278] sm:$0xff] }
  0x47   : > { %398 = vmatpush.msra.mxu0 %v289_v29  ;;  %436 = vmatpush.msra.mxu2 %v323_v35  ;;  %v378_v56 = vld [vmem:[#allocation5 + $0x2f8] sm:$0xff]  ;;  %v335_v58 = vld [vmem:[#allocation5 + $0x1a0] sm:$0xff]  ;;  %v361_v59 = vld [vmem:[#allocation5 + $0x270] sm:$0xff] }
  0x48   : > { %418 = vmatpush.msra.mxu1 %v305_v30  ;;  %456 = vmatpush.msra.mxu3 %v339_v40  ;;  %v318_v57 = vld [vmem:[#allocation5 + $0x118] sm:$0xff]  ;;  %v377_v60 = vld [vmem:[#allocation5 + $0x2f0] sm:$0xff]  ;;  %v360_v63 = vld [vmem:[#allocation5 + $0x268] sm:$0xff] }
  0x49   : > { %399 = vmatpush.msra.mxu0 %v288_v33  ;;  %437 = vmatpush.msra.mxu2 %v322_v39  ;;  %v317_v61 = vld [vmem:[#allocation5 + $0x110] sm:$0xff]  ;;  %v334_v62 = vld [vmem:[#allocation5 + $0x198] sm:$0xff]  ;;  %v376_v0 = vld [vmem:[#allocation5 + $0x2e8] sm:$0xff] }
  0x4a   : > { %419 = vmatpush.msra.mxu1 %v304_v34  ;;  %457 = vmatpush.msra.mxu3 %v338_v44  ;;  %v316_v1 = vld [vmem:[#allocation5 + $0x108] sm:$0xff]  ;;  %v333_v2 = vld [vmem:[#allocation5 + $0x190] sm:$0xff]  ;;  %v359_v3 = vld [vmem:[#allocation5 + $0x260] sm:$0xff] }
  0x4b   : > { %400 = vmatpush.msra.mxu0 %v287_v37  ;;  %438 = vmatpush.msra.mxu2 %v321_v43  ;;  %v375_v4 = vld [vmem:[#allocation5 + $0x2e0] sm:$0xff]  ;;  %v332_v6 = vld [vmem:[#allocation5 + $0x188] sm:$0xff]  ;;  %v358_v7 = vld [vmem:[#allocation5 + $0x258] sm:$0xff] }
  0x4c   : > { %420 = vmatpush.msra.mxu1 %v303_v38  ;;  %458 = vmatpush.msra.mxu3 %v337_v48  ;;  %v315_v5 = vld [vmem:[#allocation5 + $0x100] sm:$0xff]  ;;  %v374_v8 = vld [vmem:[#allocation5 + $0x2d8] sm:$0xff]  ;;  %v357_v11 = vld [vmem:[#allocation5 + $0x250] sm:$0xff] }
  0x4d   : > { %401 = vmatpush.msra.mxu0 %v286_v41  ;;  %439 = vmatpush.msra.mxu2 %v320_v47  ;;  %v278_v9 = vld [vmem:[%s1061_s6 + $0x10] sm:$0xff]  ;;  %v373_v12 = vld [vmem:[#allocation5 + $0x2d0] sm:$0xff]  ;;  %v380_v13 = vld [vmem:[#allocation5 + $0x308] sm:$0xff] }
  0x4e   : > { %421 = vmatpush.msra.mxu1 %v302_v42  ;;  %459 = vmatpush.msra.mxu3 %v336_v52  ;;  %v331_v10 = vld [vmem:[#allocation5 + $0x180] sm:$0xff]  ;;  %v276_v14 = vld [vmem:[%s1061_s6] sm:$0xff]  ;;  %v277_v18 = vld [vmem:[%s1061_s6 + $0x8] sm:$0xff] }
  0x4f   : > { %402 = vmatpush.msra.mxu0 %v285_v45  ;;  %440 = vmatpush.msra.mxu2 %v319_v51  ;;  %v356_v15 = vld [vmem:[#allocation5 + $0x248] sm:$0xff]  ;;  %v355_v19 = vld [vmem:[#allocation5 + $0x240] sm:$0xff]  ;;  %v354_v23 = vld [vmem:[#allocation5 + $0x238] sm:$0xff] }
  0x50   : > { %422 = vmatpush.msra.mxu1 %v301_v46  ;;  %460 = vmatpush.msra.mxu3 %v335_v58  ;;  %v372_v16 = vld [vmem:[#allocation5 + $0x2c8] sm:$0xff]  ;;  %v371_v20 = vld [vmem:[#allocation5 + $0x2c0] sm:$0xff]  ;;  %v370_v24 = vld [vmem:[#allocation5 + $0x2b8] sm:$0xff] }
  0x51   : > { %403 = vmatpush.msra.mxu0 %v284_v49  ;;  %441 = vmatpush.msra.mxu2 %v318_v57  ;;  %v279_v17 = vld [vmem:[%s1061_s6 + $0x18] sm:$0xff]  ;;  %v282_v25 = vld [vmem:[%s1061_s6 + $0x30] sm:$0xff]  ;;  %v353_v27 = vld [vmem:[#allocation5 + $0x230] sm:$0xff] }
  0x52   : > { %423 = vmatpush.msra.mxu1 %v300_v50  ;;  %461 = vmatpush.msra.mxu3 %v334_v62  ;;  %v379_v21 = vld [vmem:[#allocation5 + $0x300] sm:$0xff]  ;;  %v545_v22 = vld [vmem:[#allocation7 + $0x78] sm:$0xff]  ;;  %v369_v28 = vld [vmem:[#allocation5 + $0x2b0] sm:$0xff] }
  0x53   : > { %404 = vmatpush.msra.mxu0 %v283_v53  ;;  %442 = vmatpush.msra.mxu2 %v317_v61  ;;  %v544_v26 = vld [vmem:[#allocation7 + $0x70] sm:$0xff]  ;;  %v543_v29 = vld [vmem:[#allocation7 + $0x68] sm:$0xff]  ;;  %v352_v30 = vld [vmem:[#allocation5 + $0x228] sm:$0xff] }
  0x54   : > { %424 = vmatpush.msra.mxu1 %v299_v54  ;;  %462 = vmatpush.msra.mxu3 %v333_v2  ;;  %v368_v31 = vld [vmem:[#allocation5 + $0x2a8] sm:$0xff]  ;;  %v542_v32 = vld [vmem:[#allocation7 + $0x60] sm:$0xff]  ;;  %v351_v33 = vld [vmem:[#allocation5 + $0x220] sm:$0xff] }
  0x55   : > { %469 = vmatpush.msrb.mxu0 %v362_v55  ;;  %443 = vmatpush.msra.mxu2 %v316_v1  ;;  %v367_v34 = vld [vmem:[#allocation5 + $0x2a0] sm:$0xff]  ;;  %v541_v35 = vld [vmem:[#allocation7 + $0x58] sm:$0xff]  ;;  %v350_v36 = vld [vmem:[#allocation5 + $0x218] sm:$0xff] }
  0x56   : > { %489 = vmatpush.msrb.mxu1 %v378_v56  ;;  %463 = vmatpush.msra.mxu3 %v332_v6  ;;  %v366_v37 = vld [vmem:[#allocation5 + $0x298] sm:$0xff]  ;;  %v349_v38 = vld [vmem:[#allocation5 + $0x210] sm:$0xff]  ;;  %v348_v40 = vld [vmem:[#allocation5 + $0x208] sm:$0xff] }
  0x57   : > { %470 = vmatpush.msrb.mxu0 %v361_v59  ;;  %444 = vmatpush.msra.mxu2 %v315_v5  ;;  %v365_v39 = vld [vmem:[#allocation5 + $0x290] sm:$0xff]  ;;  %v364_v41 = vld [vmem:[#allocation5 + $0x288] sm:$0xff]  ;;  %v347_v42 = vld [vmem:[#allocation5 + $0x200] sm:$0xff] }
  0x58   : > { %490 = vmatpush.msrb.mxu1 %v377_v60  ;;  %445 = vmatmul.f32.vlgmr.msra.gmra.mxu2 %v278_v9  ;;  %v363_v43 = vld [vmem:[#allocation5 + $0x280] sm:$0xff]  ;;  %v280_v44 = vld [vmem:[%s1061_s6 + $0x20] sm:$0xff]  ;;  %v281_v45 = vld [vmem:[%s1061_s6 + $0x28] sm:$0xff] }
  0x59   : > { %471 = vmatpush.msrb.mxu0 %v360_v63  ;;  %464 = vmatpush.msra.mxu3 %v331_v10  ;;  %v540_v46 = vld [vmem:[#allocation7 + $0x50] sm:$0xff]  ;;  %v539_v47 = vld [vmem:[#allocation7 + $0x48] sm:$0xff]  ;;  %v538_v48 = vld [vmem:[#allocation7 + $0x40] sm:$0xff] }
  0x5a   : > { %491 = vmatpush.msrb.mxu1 %v376_v0  ;;  %523 = vmatpush.msrb.mxu2 %v380_v13  ;;  %v537_v49 = vld [vmem:[#allocation7 + $0x38] sm:$0xff]  ;;  %v536_v50 = vld [vmem:[#allocation7 + $0x30] sm:$0xff]  ;;  %v535_v51 = vld [vmem:[#allocation7 + $0x28] sm:$0xff] }
  0x5b   : > { %472 = vmatpush.msrb.mxu0 %v359_v3  ;;  %465 = vmatmul.f32.vlgmr.msra.gmra.mxu3 %v279_v17  ;;  %v534_v52 = vld [vmem:[#allocation7 + $0x20] sm:$0xff]  ;;  %v533_v53 = vld [vmem:[#allocation7 + $0x18] sm:$0xff]  ;;  %v532_v54 = vld [vmem:[#allocation7 + $0x10] sm:$0xff] }
  0x5c   : > { %492 = vmatpush.msrb.mxu1 %v375_v4  ;;  %405 = vmatmul.f32.vlgmr.msra.gmra.mxu0 %v276_v14  ;;  %v531_v55 = vld [vmem:[#allocation7 + $0x8] sm:$0xff]  ;;  %v530_v56 = vld [vmem:[#allocation7] sm:$0xff] }
  0x5d   : > { %473 = vmatpush.msrb.mxu0 %v358_v7  ;;  %425 = vmatmul.f32.vlgmr.msra.gmra.mxu1 %v277_v18  ;;  %v763_v57 = vld [vmem:[%s1120_s2] ss:$0 sm:$0xff] }
  0x5e   : > { %493 = vmatpush.msrb.mxu1 %v374_v8  ;;  %524 = vmatpush.msrb.mxu2 %v379_v21  ;;  %v764_v9 = vld [vmem:[%s1122_s4] ss:$0 sm:$0xff] }
  0x5f   : > { %474 = vmatpush.msrb.mxu0 %v357_v11  ;;  %550 = vmatpush.msrb.mxu3 %v545_v22 }
  0x60   : > { %494 = vmatpush.msrb.mxu1 %v373_v12  ;;  %686 = vmatmul.msk.f32.vlgmr.msrb.gmra.mxu2 %vm385_vm0, %v282_v25 }
  0x61   : > { %475 = vmatpush.msrb.mxu0 %v356_v15  ;;  %551 = vmatpush.msrb.mxu3 %v544_v26 }
  0x62   : > { %495 = vmatpush.msrb.mxu1 %v372_v16 }
  0x63   : > { %476 = vmatpush.msrb.mxu0 %v355_v19  ;;  %552 = vmatpush.msrb.mxu3 %v543_v29 }
  0x64   : > { %496 = vmatpush.msrb.mxu1 %v371_v20 }
  0x65   : > { %477 = vmatpush.msrb.mxu0 %v354_v23  ;;  %553 = vmatpush.msrb.mxu3 %v542_v32 }
  0x66   : > { %497 = vmatpush.msrb.mxu1 %v370_v24 }
  0x67   : > { %478 = vmatpush.msrb.mxu0 %v353_v27  ;;  %554 = vmatpush.msrb.mxu3 %v541_v35 }
  0x68   : > { %498 = vmatpush.msrb.mxu1 %v369_v28 }
  0x69   : > { %479 = vmatpush.msrb.mxu0 %v352_v30  ;;  %555 = vmatpush.msrb.mxu3 %v540_v46 }
  0x6a   : > { %499 = vmatpush.msrb.mxu1 %v368_v31 }
  0x6b   : > { %480 = vmatpush.msrb.mxu0 %v351_v33  ;;  %556 = vmatpush.msrb.mxu3 %v539_v47 }
  0x6c   : > { %500 = vmatpush.msrb.mxu1 %v367_v34 }
  0x6d   : > { %481 = vmatpush.msrb.mxu0 %v350_v36  ;;  %557 = vmatpush.msrb.mxu3 %v538_v48 }
  0x6e   : > { %501 = vmatpush.msrb.mxu1 %v366_v37 }
  0x6f   : > { %482 = vmatpush.msrb.mxu0 %v349_v38  ;;  %558 = vmatpush.msrb.mxu3 %v537_v49 }
  0x70   : > { %502 = vmatpush.msrb.mxu1 %v365_v39 }
  0x71   : > { %483 = vmatpush.msrb.mxu0 %v348_v40  ;;  %559 = vmatpush.msrb.mxu3 %v536_v50 }
  0x72   : > { %503 = vmatpush.msrb.mxu1 %v364_v41 }
  0x73   : > { %484 = vmatpush.msrb.mxu0 %v347_v42  ;;  %560 = vmatpush.msrb.mxu3 %v535_v51 }
  0x74   : > { %504 = vmatpush.msrb.mxu1 %v363_v43  ;;  %485 = vmatmul.f32.vlgmr.msrb.gmra.mxu0 %v280_v44 }
  0x75   : > { %505 = vmatmul.f32.vlgmr.msrb.gmra.mxu1 %v281_v45  ;;  %561 = vmatpush.msrb.mxu3 %v534_v52 }
  0x77   : > { %562 = vmatpush.msrb.mxu3 %v533_v53 }
  0x79   : > { %563 = vmatpush.msrb.mxu3 %v532_v54 }
  0x7b   : > { %564 = vmatpush.msrb.mxu3 %v531_v55 }
  0x7d   : > { %565 = vmatpush.msrb.mxu3 %v530_v56 }
  0xd9   : > { %v406_v58 = vpop.f32.mrf.mxu0 }
  0xda   : > { %v407_v59 = vadd.f32 %v763_v57, %v406_v58  ;;  %v426_v60 = vpop.f32.mrf.mxu1 }
  0xdb   : > { %v446_v62 = vpop.f32.mrf.mxu2 }
  0xdc   : > { %v427_v61 = vadd.f32 %v426_v60, %v407_v59 }
  0xde   : > { %v447_v63 = vadd.f32 %v446_v62, %v427_v61  ;;  %v466_v0 = vpop.f32.mrf.mxu3 }
  0xe0   : > { %v467_v1 = vadd.f32 %v466_v0, %v447_v63 }
  0xe3   : > { %v526_v5 = vpop.f32.mrf.mxu2 }
  0xf1   : > { %v486_v2 = vpop.f32.mrf.mxu0 }
  0xf2   : > { %v506_v3 = vpop.f32.mrf.mxu1  ;;  %v487_v4 = vadd.f32 %v486_v2, %v467_v1 }
  0xf4   : > { %v507_v6 = vadd.f32 %v506_v3, %v487_v4 }
  0xf6   : > { %v527_v7 = vadd.f32 %v526_v5, %v507_v6 }
  0xf8   : > { %765 = vtanh.f32 %v527_v7 }
  0xfe   : > { %v766_v8 = vpop.eup %765 }
  0xff   : > { %566 = vmatmul.f32.vlgmr.msrb.gmra.mxu3 %v766_v8 }
 0x182   : > { %v567_v10 = vpop.f32.mrf.mxu3 }
 0x183   : > { %v568_v11 = vadd.f32 %v764_v9, %v567_v10 }
 0x185   : > { %570 = vst [vmem:[%s275_s14] sm:$0xff] %v568_v11 }
 0x186   : > { %884 = shalt.err (!%p881_p9)
}
 0x187   : > { %704 = dma.vmem_to_hbm [thread:$0]  (%p1028_p4), %s585_s29, 128, %s587_s30, %s572_s27  }
 0x188 PF: > { %s598_s17 = sand.u32 1, %s915_s18   ;;  %p1131_p10 = scmp.ge.s32.totalorder %s927_s21, 2 }
 0x189   : > { %s599_s7 = scalar_lea.sflag [#allocation4], %s598_s17 }
 0x18a   : > { %p718_p11 = pnand %p1131_p10, %p1032_p6 }
 0x18c   : > { %p719_p13 = pneg %p718_p11 }
 0x18e   : > { %910 = dma.done.wait (%p719_p13), %s599_s7, 128  }
 0x18f   : > { %912 = vsyncadd (%p719_p13), %s599_s7, 4294967168  ;;  %p19_p0 = scmp.ge.s32.totalorder %s1006_s12, 4   ;;  %s1132_s18 = smov %s919_s19 }
 0x190   : > { %s1133_s19 = smov %s923_s20  ;;  %s1134_s20 = smov %s1017_s15 }
 0x191   : > { %s1135_s21 = smov %s1006_s12  ;;  %21 = sbr.rel (!%p19_p0) target bundleno = 8 (0x8), region = 93 }
 0x196   :  { %605 = vsyncpa [#allocation3], 1 }
 0x197   :  { %607 = vsyncpa [#allocation3 + $0x1], 1 }
 0x198   :  { %608 = vsyncpa [#allocation6], 1 }
 0x199   :  { %609 = vsyncpa [#allocation4], 1 }
 0x19a   :  { %611 = vsyncpa [#allocation4 + $0x1], 1 }

</bundles_post_ra>
